<compile_context>
chip_gen: v6e
topology: v6e:2x2x1
jax: 0.10.0
libtpu: 0.0.40
codegen_flags: <defaults>
</compile_context>

<pallas_src>
import functools

import jax
import jax.numpy as jnp
from jax import lax
from jax.experimental import pallas as pl
from jax.experimental.pallas import tpu as pltpu


# ----------------------------- fused Pallas kernel ------------------------------

def _apply_act(y, act):
    if act == "relu":
        return jnp.maximum(y, 0.0)
    if act == "sigmoid":
        return 1.0 / (1.0 + jnp.exp(-y))
    return y


def make_fused_dlrm_kernel(num_tables, batch, bag_len, bot_acts, top_acts,
                           interaction_itself):
    """Builds the fused kernel. Ref order:
       dense, indices, tables, (w,b) x n_bot, (w,b) x n_top, out."""
    n_bot = len(bot_acts)
    n_top = len(top_acts)

    def kernel(*refs):
        dense_ref, idx_ref, tables_ref = refs[0], refs[1], refs[2]
        pos = 3
        bot_refs = [(refs[pos + 2 * i], refs[pos + 2 * i + 1]) for i in range(n_bot)]
        pos += 2 * n_bot
        top_refs = [(refs[pos + 2 * i], refs[pos + 2 * i + 1]) for i in range(n_top)]
        pos += 2 * n_top
        out_ref = refs[pos]

        # ---- bottom MLP (fused matmul + bias + activation, f32 accumulate) ----
        x = dense_ref[...]
        for (w_ref, b_ref), act in zip(bot_refs, bot_acts):
            y = jnp.dot(x, w_ref[...], preferred_element_type=jnp.float32) + b_ref[...]
            x = _apply_act(y, act)

        # ---- embedding bags (sum mode): count-matrix @ table on the MXU ----
        n_rows = tables_ref.shape[1]
        iota_rows = lax.broadcasted_iota(jnp.int32, (batch, n_rows), 1)
        ly = []
        for t in range(num_tables):                 # static, small table count
            idx_t = idx_ref[t]                      # (batch, bag_len) int32
            counts = jnp.zeros((batch, n_rows), jnp.float32)
            for l in range(bag_len):                # static, vectorized over batch
                counts = counts + (idx_t[:, l:l + 1] == iota_rows).astype(jnp.float32)
            ly.append(jnp.dot(counts, tables_ref[t],
                              preferred_element_type=jnp.float32))   # (batch, m)

        # ---- dot interaction + strict-lower-triangle flatten (VPU, static) ----
        feats = [x] + ly                            # F features, each (batch, d)
        off = 1 if interaction_itself else 0
        zcols = []
        for i in range(len(feats)):                 # matches PyTorch li/lj ordering
            for j in range(i + off):
                zcols.append(jnp.sum(feats[i] * feats[j], axis=1, keepdims=True))
        r = jnp.concatenate([x] + zcols, axis=1)    # (batch, d + num_pairs)

        # ---- top MLP (last layer sigmoid) ----
        p = r
        for (w_ref, b_ref), act in zip(top_refs, top_acts):
            y = jnp.dot(p, w_ref[...], preferred_element_type=jnp.float32) + b_ref[...]
            p = _apply_act(y, act)

        out_ref[...] = p.astype(out_ref.dtype)

    return kernel


# ------------------------------ DLRM wrapper -------------------------------

def _normal(key, shape, std):
    return std * jax.random.normal(key, shape, dtype=jnp.float32)


def _make_mlp_params(key, ln, sigmoid_layer):
    params = []
    for i in range(len(ln) - 1):
        n, m = int(ln[i]), int(ln[i + 1])
        key, kw, kb = jax.random.split(key, 3)
        W = _normal(kw, (m, n), jnp.sqrt(2.0 / (m + n)))       # PyTorch (out, in)
        b = _normal(kb, (m,), jnp.sqrt(1.0 / m))
        act = "sigmoid" if i == sigmoid_layer else "relu"
        params.append((W.T, b.reshape(1, -1), act))            # store (in,out), (1,out)
    return params, key


class DLRMNetPallas:
    def __init__(self, key, m_spa, num_tables, n_rows, ln_bot, ln_top,
                 sigmoid_bot=-1, sigmoid_top=-1, arch_interaction_itself=False):
        self.m_spa = m_spa
        self.arch_interaction_itself = arch_interaction_itself
        # embedding tables: uniform(-sqrt(1/n), sqrt(1/n)), shape (n, m)
        tables = []
        for _ in range(num_tables):
            key, kt = jax.random.split(key)
            bound = jnp.sqrt(1.0 / n_rows)
            tables.append(jax.random.uniform(
                kt, (n_rows, m_spa), jnp.float32, minval=-bound, maxval=bound))
        self.tables = jnp.stack(tables)                         # (T, n, m)
        self.bot_l, key = _make_mlp_params(key, ln_bot, sigmoid_bot)
        self.top_l, key = _make_mlp_params(key, ln_top, sigmoid_top)

    def forward(self, dense_x, indices):
        """dense_x: (B, ln_bot[0]) f32; indices: (T, B, L) int32 -> (B, ln_top[-1])."""
        B = dense_x.shape[0]
        T, _, L = indices.shape
        bot_acts = tuple(a for _, _, a in self.bot_l)
        top_acts = tuple(a for _, _, a in self.top_l)
        kernel = make_fused_dlrm_kernel(T, B, L, bot_acts, top_acts,
                                        self.arch_interaction_itself)
        args = [dense_x, indices, self.tables]
        for w_t, b, _ in self.bot_l:
            args += [w_t, b]
        for w_t, b, _ in self.top_l:
            args += [w_t, b]
        out_dim = self.top_l[-1][0].shape[1]
        vmem = pl.BlockSpec(memory_space=pltpu.MemorySpace.VMEM)
        return pl.pallas_call(
            kernel,
            out_shape=jax.ShapeDtypeStruct((B, out_dim), jnp.float32),
            in_specs=[vmem] * len(args),
            out_specs=vmem,
        )(*args)


# ------------------------------ pure-JAX ref -------------------------------

def reference_forward(model, dense_x, indices):
    x = dense_x
    for w_t, b, act in model.bot_l:
        x = x @ w_t + b
        x = jnp.maximum(x, 0.0) if act == "relu" else jax.nn.sigmoid(x)
    T, B, L = indices.shape
    ly = jnp.stack([model.tables[t][indices[t]].sum(axis=1) for t in range(T)])
    t_cat = jnp.concatenate([x[:, None, :], jnp.transpose(ly, (1, 0, 2))], axis=1)
    Z = jnp.einsum("bfd,bgd->bfg", t_cat, t_cat)
    F = t_cat.shape[1]
    off = 1 if model.arch_interaction_itself else 0
    li = jnp.array([i for i in range(F) for j in range(i + off)], dtype=jnp.int32)
    lj = jnp.array([j for i in range(F) for j in range(i + off)], dtype=jnp.int32)
    R = jnp.concatenate([x, Z[:, li, lj]], axis=1)
    p = R
    for w_t, b, act in model.top_l:
        p = p @ w_t + b
        p = jnp.maximum(p, 0.0) if act == "relu" else jax.nn.sigmoid(p)
    return p


# --------------------------------- driver ----------------------------------

if __name__ == "__main__":
    key = jax.random.PRNGKey(0)

    B = 8             # batch
    L = 4             # fixed bag length (indices per lookup)
    m_spa = 16        # embedding dim == bottom-MLP output dim
    num_tables = 3
    n_rows = 64
    ln_bot = [13, 32, 16]
    F = 1 + num_tables
    num_pairs = F * (F - 1) // 2
    ln_top = [m_spa + num_pairs, 32, 1]

    key, k_model, k_dense, k_idx = jax.random.split(key, 4)
    model = DLRMNetPallas(k_model, m_spa, num_tables, n_rows, ln_bot, ln_top,
                          sigmoid_bot=-1, sigmoid_top=len(ln_top) - 2)

    dense_x = jax.random.normal(k_dense, (B, ln_bot[0]), dtype=jnp.float32)
    indices = jax.random.randint(
        k_idx, (num_tables, B, L), 0, n_rows, dtype=jnp.int32)

    out = model.forward(dense_x, indices)
    out = jax.block_until_ready(out)

    ref = reference_forward(model, dense_x, indices)
    assert out.shape == (B, 1)
    assert jnp.allclose(out, ref, atol=1e-4, rtol=1e-4), "mismatch vs reference"

    print("KERNEL_OK")
</pallas_src>

<mosaic_0001>
module attributes {stable_mosaic.version = 11 : i64} {
  func.func @kernel(%arg0: memref<8x13xf32, #tpu.memory_space<vmem>>, %arg1: memref<3x8x4xi32, #tpu.memory_space<vmem>>, %arg2: memref<3x64x16xf32, #tpu.memory_space<vmem>>, %arg3: memref<13x32xf32, #tpu.memory_space<vmem>>, %arg4: memref<1x32xf32, #tpu.memory_space<vmem>>, %arg5: memref<32x16xf32, #tpu.memory_space<vmem>>, %arg6: memref<1x16xf32, #tpu.memory_space<vmem>>, %arg7: memref<22x32xf32, #tpu.memory_space<vmem>>, %arg8: memref<1x32xf32, #tpu.memory_space<vmem>>, %arg9: memref<32x1xf32, #tpu.memory_space<vmem>>, %arg10: memref<1x1xf32, #tpu.memory_space<vmem>>, %arg11: memref<8x1xf32, #tpu.memory_space<vmem>>) attributes {dimension_semantics = [], scalar_prefetch = 0 : i64, scratch_operands = 0 : i64, tpu.core_type = #tpu.core_type<tc>} {
    %c0 = arith.constant 0 : index
    %c0_0 = arith.constant 0 : index
    %0 = vector.load %arg0[%c0, %c0_0] : memref<8x13xf32, #tpu.memory_space<vmem>>, vector<8x13xf32>
    %c0_1 = arith.constant 0 : index
    %c0_2 = arith.constant 0 : index
    %1 = vector.load %arg3[%c0_1, %c0_2] : memref<13x32xf32, #tpu.memory_space<vmem>>, vector<13x32xf32>
    %cst = arith.constant dense<0.000000e+00> : vector<8x32xf32>
    %2 = tpu.matmul %0, %1, %cst {dimension_numbers = #tpu.dot_dimension_numbers<[1], [0], [0], [1], [0, 0, 1, 1], [], []>} : vector<8x13xf32>, vector<13x32xf32>, vector<8x32xf32> -> vector<8x32xf32>
    %c0_3 = arith.constant 0 : index
    %c0_4 = arith.constant 0 : index
    %3 = vector.load %arg4[%c0_3, %c0_4] : memref<1x32xf32, #tpu.memory_space<vmem>>, vector<1x32xf32>
    %4 = vector.broadcast %3 : vector<1x32xf32> to vector<8x32xf32>
    %5 = arith.addf %2, %4 : vector<8x32xf32>
    %cst_5 = arith.constant 0.000000e+00 : f32
    %6 = vector.broadcast %cst_5 : f32 to vector<8x32xf32>
    %7 = arith.maximumf %5, %6 : vector<8x32xf32>
    %c0_6 = arith.constant 0 : index
    %c0_7 = arith.constant 0 : index
    %8 = vector.load %arg5[%c0_6, %c0_7] : memref<32x16xf32, #tpu.memory_space<vmem>>, vector<32x16xf32>
    %cst_8 = arith.constant dense<0.000000e+00> : vector<8x16xf32>
    %9 = tpu.matmul %7, %8, %cst_8 {dimension_numbers = #tpu.dot_dimension_numbers<[1], [0], [0], [1], [0, 0, 1, 1], [], []>} : vector<8x32xf32>, vector<32x16xf32>, vector<8x16xf32> -> vector<8x16xf32>
    %c0_9 = arith.constant 0 : index
    %c0_10 = arith.constant 0 : index
    %10 = vector.load %arg6[%c0_9, %c0_10] : memref<1x16xf32, #tpu.memory_space<vmem>>, vector<1x16xf32>
    %11 = vector.broadcast %10 : vector<1x16xf32> to vector<8x16xf32>
    %12 = arith.addf %9, %11 : vector<8x16xf32>
    %cst_11 = arith.constant 0.000000e+00 : f32
    %13 = vector.broadcast %cst_11 : f32 to vector<8x16xf32>
    %14 = arith.maximumf %12, %13 : vector<8x16xf32>
    %15 = tpu.iota {dimensions = array<i32: 1>} : vector<8x64xi32>
    %c0_12 = arith.constant 0 : index
    %c0_13 = arith.constant 0 : index
    %c0_14 = arith.constant 0 : index
    %16 = vector.load %arg1[%c0_12, %c0_13, %c0_14] : memref<3x8x4xi32, #tpu.memory_space<vmem>>, vector<1x8x4xi32>
    %17 = vector.shape_cast %16 : vector<1x8x4xi32> to vector<8x4xi32>
    %cst_15 = arith.constant 0.000000e+00 : f32
    %18 = vector.broadcast %cst_15 : f32 to vector<8x64xf32>
    %19 = vector.extract_strided_slice %17 {offsets = [0, 0], sizes = [8, 1], strides = [1, 1]} : vector<8x4xi32> to vector<8x1xi32>
    %20 = vector.broadcast %19 : vector<8x1xi32> to vector<8x64xi32>
    %21 = arith.cmpi eq, %20, %15 : vector<8x64xi32>
    %22 = arith.extui %21 : vector<8x64xi1> to vector<8x64xi32>
    %23 = arith.sitofp %22 : vector<8x64xi32> to vector<8x64xf32>
    %24 = arith.addf %18, %23 : vector<8x64xf32>
    %25 = vector.extract_strided_slice %17 {offsets = [0, 1], sizes = [8, 1], strides = [1, 1]} : vector<8x4xi32> to vector<8x1xi32>
    %26 = vector.broadcast %25 : vector<8x1xi32> to vector<8x64xi32>
    %27 = arith.cmpi eq, %26, %15 : vector<8x64xi32>
    %28 = arith.extui %27 : vector<8x64xi1> to vector<8x64xi32>
    %29 = arith.sitofp %28 : vector<8x64xi32> to vector<8x64xf32>
    %30 = arith.addf %24, %29 : vector<8x64xf32>
    %31 = vector.extract_strided_slice %17 {offsets = [0, 2], sizes = [8, 1], strides = [1, 1]} : vector<8x4xi32> to vector<8x1xi32>
    %32 = vector.broadcast %31 : vector<8x1xi32> to vector<8x64xi32>
    %33 = arith.cmpi eq, %32, %15 : vector<8x64xi32>
    %34 = arith.extui %33 : vector<8x64xi1> to vector<8x64xi32>
    %35 = arith.sitofp %34 : vector<8x64xi32> to vector<8x64xf32>
    %36 = arith.addf %30, %35 : vector<8x64xf32>
    %37 = vector.extract_strided_slice %17 {offsets = [0, 3], sizes = [8, 1], strides = [1, 1]} : vector<8x4xi32> to vector<8x1xi32>
    %38 = vector.broadcast %37 : vector<8x1xi32> to vector<8x64xi32>
    %39 = arith.cmpi eq, %38, %15 : vector<8x64xi32>
    %40 = arith.extui %39 : vector<8x64xi1> to vector<8x64xi32>
    %41 = arith.sitofp %40 : vector<8x64xi32> to vector<8x64xf32>
    %42 = arith.addf %36, %41 : vector<8x64xf32>
    %c0_16 = arith.constant 0 : index
    %c0_17 = arith.constant 0 : index
    %c0_18 = arith.constant 0 : index
    %43 = vector.load %arg2[%c0_16, %c0_17, %c0_18] : memref<3x64x16xf32, #tpu.memory_space<vmem>>, vector<1x64x16xf32>
    %44 = vector.shape_cast %43 : vector<1x64x16xf32> to vector<64x16xf32>
    %cst_19 = arith.constant dense<0.000000e+00> : vector<8x16xf32>
    %45 = tpu.matmul %42, %44, %cst_19 {dimension_numbers = #tpu.dot_dimension_numbers<[1], [0], [0], [1], [0, 0, 1, 1], [], []>} : vector<8x64xf32>, vector<64x16xf32>, vector<8x16xf32> -> vector<8x16xf32>
    %c1 = arith.constant 1 : index
    %c0_20 = arith.constant 0 : index
    %c0_21 = arith.constant 0 : index
    %46 = vector.load %arg1[%c1, %c0_20, %c0_21] : memref<3x8x4xi32, #tpu.memory_space<vmem>>, vector<1x8x4xi32>
    %47 = vector.shape_cast %46 : vector<1x8x4xi32> to vector<8x4xi32>
    %cst_22 = arith.constant 0.000000e+00 : f32
    %48 = vector.broadcast %cst_22 : f32 to vector<8x64xf32>
    %49 = vector.extract_strided_slice %47 {offsets = [0, 0], sizes = [8, 1], strides = [1, 1]} : vector<8x4xi32> to vector<8x1xi32>
    %50 = vector.broadcast %49 : vector<8x1xi32> to vector<8x64xi32>
    %51 = arith.cmpi eq, %50, %15 : vector<8x64xi32>
    %52 = arith.extui %51 : vector<8x64xi1> to vector<8x64xi32>
    %53 = arith.sitofp %52 : vector<8x64xi32> to vector<8x64xf32>
    %54 = arith.addf %48, %53 : vector<8x64xf32>
    %55 = vector.extract_strided_slice %47 {offsets = [0, 1], sizes = [8, 1], strides = [1, 1]} : vector<8x4xi32> to vector<8x1xi32>
    %56 = vector.broadcast %55 : vector<8x1xi32> to vector<8x64xi32>
    %57 = arith.cmpi eq, %56, %15 : vector<8x64xi32>
    %58 = arith.extui %57 : vector<8x64xi1> to vector<8x64xi32>
    %59 = arith.sitofp %58 : vector<8x64xi32> to vector<8x64xf32>
    %60 = arith.addf %54, %59 : vector<8x64xf32>
    %61 = vector.extract_strided_slice %47 {offsets = [0, 2], sizes = [8, 1], strides = [1, 1]} : vector<8x4xi32> to vector<8x1xi32>
    %62 = vector.broadcast %61 : vector<8x1xi32> to vector<8x64xi32>
    %63 = arith.cmpi eq, %62, %15 : vector<8x64xi32>
    %64 = arith.extui %63 : vector<8x64xi1> to vector<8x64xi32>
    %65 = arith.sitofp %64 : vector<8x64xi32> to vector<8x64xf32>
    %66 = arith.addf %60, %65 : vector<8x64xf32>
    %67 = vector.extract_strided_slice %47 {offsets = [0, 3], sizes = [8, 1], strides = [1, 1]} : vector<8x4xi32> to vector<8x1xi32>
    %68 = vector.broadcast %67 : vector<8x1xi32> to vector<8x64xi32>
    %69 = arith.cmpi eq, %68, %15 : vector<8x64xi32>
    %70 = arith.extui %69 : vector<8x64xi1> to vector<8x64xi32>
    %71 = arith.sitofp %70 : vector<8x64xi32> to vector<8x64xf32>
    %72 = arith.addf %66, %71 : vector<8x64xf32>
    %c1_23 = arith.constant 1 : index
    %c0_24 = arith.constant 0 : index
    %c0_25 = arith.constant 0 : index
    %73 = vector.load %arg2[%c1_23, %c0_24, %c0_25] : memref<3x64x16xf32, #tpu.memory_space<vmem>>, vector<1x64x16xf32>
    %74 = vector.shape_cast %73 : vector<1x64x16xf32> to vector<64x16xf32>
    %cst_26 = arith.constant dense<0.000000e+00> : vector<8x16xf32>
    %75 = tpu.matmul %72, %74, %cst_26 {dimension_numbers = #tpu.dot_dimension_numbers<[1], [0], [0], [1], [0, 0, 1, 1], [], []>} : vector<8x64xf32>, vector<64x16xf32>, vector<8x16xf32> -> vector<8x16xf32>
    %c2 = arith.constant 2 : index
    %c0_27 = arith.constant 0 : index
    %c0_28 = arith.constant 0 : index
    %76 = vector.load %arg1[%c2, %c0_27, %c0_28] : memref<3x8x4xi32, #tpu.memory_space<vmem>>, vector<1x8x4xi32>
    %77 = vector.shape_cast %76 : vector<1x8x4xi32> to vector<8x4xi32>
    %cst_29 = arith.constant 0.000000e+00 : f32
    %78 = vector.broadcast %cst_29 : f32 to vector<8x64xf32>
    %79 = vector.extract_strided_slice %77 {offsets = [0, 0], sizes = [8, 1], strides = [1, 1]} : vector<8x4xi32> to vector<8x1xi32>
    %80 = vector.broadcast %79 : vector<8x1xi32> to vector<8x64xi32>
    %81 = arith.cmpi eq, %80, %15 : vector<8x64xi32>
    %82 = arith.extui %81 : vector<8x64xi1> to vector<8x64xi32>
    %83 = arith.sitofp %82 : vector<8x64xi32> to vector<8x64xf32>
    %84 = arith.addf %78, %83 : vector<8x64xf32>
    %85 = vector.extract_strided_slice %77 {offsets = [0, 1], sizes = [8, 1], strides = [1, 1]} : vector<8x4xi32> to vector<8x1xi32>
    %86 = vector.broadcast %85 : vector<8x1xi32> to vector<8x64xi32>
    %87 = arith.cmpi eq, %86, %15 : vector<8x64xi32>
    %88 = arith.extui %87 : vector<8x64xi1> to vector<8x64xi32>
    %89 = arith.sitofp %88 : vector<8x64xi32> to vector<8x64xf32>
    %90 = arith.addf %84, %89 : vector<8x64xf32>
    %91 = vector.extract_strided_slice %77 {offsets = [0, 2], sizes = [8, 1], strides = [1, 1]} : vector<8x4xi32> to vector<8x1xi32>
    %92 = vector.broadcast %91 : vector<8x1xi32> to vector<8x64xi32>
    %93 = arith.cmpi eq, %92, %15 : vector<8x64xi32>
    %94 = arith.extui %93 : vector<8x64xi1> to vector<8x64xi32>
    %95 = arith.sitofp %94 : vector<8x64xi32> to vector<8x64xf32>
    %96 = arith.addf %90, %95 : vector<8x64xf32>
    %97 = vector.extract_strided_slice %77 {offsets = [0, 3], sizes = [8, 1], strides = [1, 1]} : vector<8x4xi32> to vector<8x1xi32>
    %98 = vector.broadcast %97 : vector<8x1xi32> to vector<8x64xi32>
    %99 = arith.cmpi eq, %98, %15 : vector<8x64xi32>
    %100 = arith.extui %99 : vector<8x64xi1> to vector<8x64xi32>
    %101 = arith.sitofp %100 : vector<8x64xi32> to vector<8x64xf32>
    %102 = arith.addf %96, %101 : vector<8x64xf32>
    %c2_30 = arith.constant 2 : index
    %c0_31 = arith.constant 0 : index
    %c0_32 = arith.constant 0 : index
    %103 = vector.load %arg2[%c2_30, %c0_31, %c0_32] : memref<3x64x16xf32, #tpu.memory_space<vmem>>, vector<1x64x16xf32>
    %104 = vector.shape_cast %103 : vector<1x64x16xf32> to vector<64x16xf32>
    %cst_33 = arith.constant dense<0.000000e+00> : vector<8x16xf32>
    %105 = tpu.matmul %102, %104, %cst_33 {dimension_numbers = #tpu.dot_dimension_numbers<[1], [0], [0], [1], [0, 0, 1, 1], [], []>} : vector<8x64xf32>, vector<64x16xf32>, vector<8x16xf32> -> vector<8x16xf32>
    %106 = arith.mulf %45, %14 : vector<8x16xf32>
    %cst_34 = arith.constant dense<0.000000e+00> : vector<8xf32>
    %107 = vector.multi_reduction <add>, %106, %cst_34 [1] : vector<8x16xf32> to vector<8xf32>
    %108 = vector.shape_cast %107 : vector<8xf32> to vector<8x1xf32>
    %109 = arith.mulf %75, %14 : vector<8x16xf32>
    %cst_35 = arith.constant dense<0.000000e+00> : vector<8xf32>
    %110 = vector.multi_reduction <add>, %109, %cst_35 [1] : vector<8x16xf32> to vector<8xf32>
    %111 = vector.shape_cast %110 : vector<8xf32> to vector<8x1xf32>
    %112 = arith.mulf %75, %45 : vector<8x16xf32>
    %cst_36 = arith.constant dense<0.000000e+00> : vector<8xf32>
    %113 = vector.multi_reduction <add>, %112, %cst_36 [1] : vector<8x16xf32> to vector<8xf32>
    %114 = vector.shape_cast %113 : vector<8xf32> to vector<8x1xf32>
    %115 = arith.mulf %105, %14 : vector<8x16xf32>
    %cst_37 = arith.constant dense<0.000000e+00> : vector<8xf32>
    %116 = vector.multi_reduction <add>, %115, %cst_37 [1] : vector<8x16xf32> to vector<8xf32>
    %117 = vector.shape_cast %116 : vector<8xf32> to vector<8x1xf32>
    %118 = arith.mulf %105, %45 : vector<8x16xf32>
    %cst_38 = arith.constant dense<0.000000e+00> : vector<8xf32>
    %119 = vector.multi_reduction <add>, %118, %cst_38 [1] : vector<8x16xf32> to vector<8xf32>
    %120 = vector.shape_cast %119 : vector<8xf32> to vector<8x1xf32>
    %121 = arith.mulf %105, %75 : vector<8x16xf32>
    %cst_39 = arith.constant dense<0.000000e+00> : vector<8xf32>
    %122 = vector.multi_reduction <add>, %121, %cst_39 [1] : vector<8x16xf32> to vector<8xf32>
    %123 = vector.shape_cast %122 : vector<8xf32> to vector<8x1xf32>
    %124 = tpu.concatenate %14, %108, %111, %114, %117, %120, %123 in 1 : vector<8x16xf32>, vector<8x1xf32>, vector<8x1xf32>, vector<8x1xf32>, vector<8x1xf32>, vector<8x1xf32>, vector<8x1xf32> -> vector<8x22xf32>
    %c0_40 = arith.constant 0 : index
    %c0_41 = arith.constant 0 : index
    %125 = vector.load %arg7[%c0_40, %c0_41] : memref<22x32xf32, #tpu.memory_space<vmem>>, vector<22x32xf32>
    %cst_42 = arith.constant dense<0.000000e+00> : vector<8x32xf32>
    %126 = tpu.matmul %124, %125, %cst_42 {dimension_numbers = #tpu.dot_dimension_numbers<[1], [0], [0], [1], [0, 0, 1, 1], [], []>} : vector<8x22xf32>, vector<22x32xf32>, vector<8x32xf32> -> vector<8x32xf32>
    %c0_43 = arith.constant 0 : index
    %c0_44 = arith.constant 0 : index
    %127 = vector.load %arg8[%c0_43, %c0_44] : memref<1x32xf32, #tpu.memory_space<vmem>>, vector<1x32xf32>
    %128 = vector.broadcast %127 : vector<1x32xf32> to vector<8x32xf32>
    %129 = arith.addf %126, %128 : vector<8x32xf32>
    %cst_45 = arith.constant 0.000000e+00 : f32
    %130 = vector.broadcast %cst_45 : f32 to vector<8x32xf32>
    %131 = arith.maximumf %129, %130 : vector<8x32xf32>
    %c0_46 = arith.constant 0 : index
    %c0_47 = arith.constant 0 : index
    %132 = vector.load %arg9[%c0_46, %c0_47] : memref<32x1xf32, #tpu.memory_space<vmem>>, vector<32x1xf32>
    %cst_48 = arith.constant dense<0.000000e+00> : vector<8x1xf32>
    %133 = tpu.matmul %131, %132, %cst_48 {dimension_numbers = #tpu.dot_dimension_numbers<[1], [0], [0], [1], [0, 0, 1, 1], [], []>} : vector<8x32xf32>, vector<32x1xf32>, vector<8x1xf32> -> vector<8x1xf32>
    %c0_49 = arith.constant 0 : index
    %c0_50 = arith.constant 0 : index
    %134 = vector.load %arg10[%c0_49, %c0_50] : memref<1x1xf32, #tpu.memory_space<vmem>>, vector<1x1xf32>
    %135 = vector.broadcast %134 : vector<1x1xf32> to vector<8x1xf32>
    %136 = arith.addf %133, %135 : vector<8x1xf32>
    %cst_51 = arith.constant 0.000000e+00 : f32
    %137 = vector.broadcast %cst_51 : f32 to vector<8x1xf32>
    %138 = arith.subf %137, %136 : vector<8x1xf32>
    %139 = math.exp %138 : vector<8x1xf32>
    %cst_52 = arith.constant 1.000000e+00 : f32
    %140 = vector.broadcast %cst_52 : f32 to vector<8x1xf32>
    %141 = arith.addf %140, %139 : vector<8x1xf32>
    %cst_53 = arith.constant 1.000000e+00 : f32
    %142 = vector.broadcast %cst_53 : f32 to vector<8x1xf32>
    %143 = arith.divf %142, %141 : vector<8x1xf32>
    %c0_54 = arith.constant 0 : index
    %c0_55 = arith.constant 0 : index
    %144 = vector.load %arg11[%c0_54, %c0_55] : memref<8x1xf32, #tpu.memory_space<vmem>>, vector<8x1xf32>
    tpu.vector_store %arg11[%c0_54, %c0_55], %143 {strides = array<i32>} : memref<8x1xf32, #tpu.memory_space<vmem>>, vector<8x1xf32>,
    return
  }
}

</mosaic_0001>

<bundles_post_ra>
// kernel: tpu_custom_call.1
= control target key start
LH: loop header
LB: loop body
LE: loop exit
PB: predicated region body
PF: predicated region fallthrough
CT: control target
= control target key end

     0   :  { %vm54_vm0 = vcmask 1044480   ;;  %v976_v0 = vmov 0.0   ;;  %vm977_vm1 = vmmov 0   ;;  %vm50_vm2 = vcmask 105472   ;;  %s1269_s3 = inlined_call_operand.vmem [shape: f32[13,32], index: 3, kind: input, shape index: {}]   ;;  %s1270_s0 = inlined_call_operand.vmem [shape: f32[8,13], index: 0, kind: input, shape index: {}]   ;;  %s1271_s1 = inlined_call_operand.vmem [shape: s32[3,8,4], index: 1, kind: input, shape index: {}]   ;;  %s1272_s2 = inlined_call_operand.vmem [shape: f32[3,64,16], index: 2, kind: input, shape index: {}]   ;;  %s1273_s5 = inlined_call_operand.vmem [shape: f32[32,16], index: 5, kind: input, shape index: {}]   ;;  %s1274_s4 = inlined_call_operand.vmem [shape: f32[1,32], index: 4, kind: input, shape index: {}]   ;;  %s1275_s6 = inlined_call_operand.vmem [shape: f32[1,16], index: 6, kind: input, shape index: {}]   ;;  %s1276_s7 = inlined_call_operand.vmem [shape: f32[22,32], index: 7, kind: input, shape index: {}]   ;;  %s1277_s9 = inlined_call_operand.vmem [shape: f32[32,1], index: 9, kind: input, shape index: {}]   ;;  %s1278_s10 = inlined_call_operand.<no memory space> [shape: f32[1,1], index: 10, kind: input, shape index: {}]   ;;  %s1279_s8 = inlined_call_operand.vmem [shape: f32[1,32], index: 8, kind: input, shape index: {}]   ;;  %s1280_s11 = inlined_call_operand.vmem [shape: f32[8,1], index: 11, kind: output, shape index: {}]  }
   0x1   :  { %860 = vmatprep.subr.mxu0 %v976_v0  ;;  %v42_v1 = vld [vmem:[%s1269_s3 + $0x8] sm:$0x1f]  ;;  %v41_v2 = vld [vmem:[%s1269_s3] sm:$0xff]  ;;  %864 = vmatprep.mubr.msk.f32.mxu0 %vm977_vm1, %v976_v0  ;;  %v978_v4 = vmov 2   ;;  %v979_v6 = vmov 0   ;;  %v253_v7 = vld [vmem:[%s1272_s2 + $0x38] sm:$0xff]  ;;  %v215_v23 = vlaneseq }
   0x2   :  { %861 = vmatpush3.msk.msra.mxu0 %vm54_vm0, %v42_v1  ;;  %v40_v3 = vld [vmem:[%s1270_s0] sm:$0xff]  ;;  %963 = vset.pattern.permute.xlu1 %v978_v4  ;;  %v252_v8 = vld [vmem:[%s1272_s2 + $0x30] sm:$0xff]  ;;  %v980_v9 = vmov 3   ;;  %v251_v10 = vld [vmem:[%s1272_s2 + $0x28] sm:$0xff]  ;;  %v981_v11 = vmov 1   ;;  %vm254_vm9 = vcmask 523264  }
   0x3   :  { %v217_v5 = vld [vmem:[%s1271_s1] sm:$0xff]  ;;  %862 = vmatprep.subr.mxu0 %v976_v0  ;;  %961 = vset.pattern.permute.xlu0 %v979_v6  ;;  %v783_v12 = vld [vmem:[%s1271_s1 + $0x8] sm:$0xff]  ;;  %v249_v14 = vld [vmem:[%s1272_s2 + $0x18] sm:$0xff]  ;;  %v1118_v24 = vand.u32 127, %v215_v23  ;;  %vm140_vm0 = vcmask 261120  }
   0x4   :  { %233 = vperm.xlu1 %963, %v217_v5   ;;  %863 = vmatpush3.msra.mxu0 %v41_v2  ;;  %v250_v13 = vld [vmem:[%s1272_s2 + $0x20] sm:$0xff]  ;;  %v248_v15 = vld [vmem:[%s1272_s2 + $0x10] sm:$0xff]  ;;  %v247_v16 = vld [vmem:[%s1272_s2 + $0x8] sm:$0xff] }
   0x5   :  { %865 = vmatmul.mubr.msk.f32.vlgmr.msra.gmra.mxu0 %vm50_vm2, %v40_v3  ;;  %219 = vperm.xlu0 %961, %v217_v5   ;;  %v797_v17 = vld [vmem:[%s1271_s1 + $0x10] sm:$0xff]  ;;  %v246_v18 = vld [vmem:[%s1272_s2] sm:$0xff]  ;;  %v132_v19 = vld [vmem:[%s1273_s5 + $0x18] sm:$0xff]  ;;  %vm553_vm2 = vcmask 130048  }
   0x6   :  { %878 = vmatprep.subr.mxu0 %v976_v0  ;;  %894 = vmatprep.mubr.msk.f32.mxu0 %vm977_vm1, %v976_v0  ;;  %v131_v20 = vld [vmem:[%s1273_s5 + $0x10] sm:$0xff]  ;;  %v130_v21 = vld [vmem:[%s1273_s5 + $0x8] sm:$0xff]  ;;  %v129_v22 = vld [vmem:[%s1273_s5] sm:$0xff] }
   0x7   :  { %879 = vmatpush3.msra.mxu0 %v253_v7  ;;  %867 = vmatprep.subr.mxu1 %v976_v0  ;;  %v809_v41 = vld [vmem:[%s1272_s2 + $0xb8] sm:$0xff]  ;;  %v808_v43 = vld [vmem:[%s1272_s2 + $0xb0] sm:$0xff]  ;;  %v807_v46 = vld [vmem:[%s1272_s2 + $0xa8] sm:$0xff] }
   0x8   :  { %964 = vset.pattern.permute.xlu1 %v980_v9  ;;  %880 = vmatprep.subr.mxu0 %v976_v0  ;;  %v806_v49 = vld [vmem:[%s1272_s2 + $0xa0] sm:$0xff]  ;;  %v805_v53 = vld [vmem:[%s1272_s2 + $0x98] sm:$0xff]  ;;  %v804_v55 = vld [vmem:[%s1272_s2 + $0x90] sm:$0xff] }
   0x9   :  { %240 = vperm.xlu1 %964, %v217_v5   ;;  %962 = vset.pattern.permute.xlu0 %v981_v11  ;;  %v803_v58 = vld [vmem:[%s1272_s2 + $0x88] sm:$0xff]  ;;  %v802_v62 = vld [vmem:[%s1272_s2 + $0x80] sm:$0xff] }
   0xa   :  { %881 = vmatpush3.msra.mxu0 %v252_v8  ;;  %226 = vperm.xlu0 %962, %v217_v5   ;;  %v773_v3 = vld [vmem:[%s1274_s4] ss:$0 sm:$0xff]  ;;  %v795_v8 = vld [vmem:[%s1272_s2 + $0x78] sm:$0xff] }
   0xb   :  { %882 = vmatprep.subr.mxu0 %v976_v0  ;;  %875 = vmatprep.mubr.msk.f32.mxu1 %vm977_vm1, %v976_v0 }
   0xc   :  { %883 = vmatpush3.msra.mxu0 %v251_v10  ;;  %868 = vmatpush3.msra.mxu1 %v132_v19  ;;  %v793_v10 = vld [vmem:[%s1272_s2 + $0x68] sm:$0xff] }
   0xd   :  { %965 = vset.pattern.permute.xlu1 %v979_v6  ;;  %884 = vmatprep.subr.mxu0 %v976_v0 }
   0xe   :  { %331 = vperm.xlu1 %965, %v783_v12   ;;  %885 = vmatpush3.msra.mxu0 %v250_v13  ;;  %v790_v13 = vld [vmem:[%s1272_s2 + $0x50] sm:$0xff] }
   0xf   :  { %338 = vperm.xlu0 %962, %v783_v12   ;;  %886 = vmatprep.subr.mxu0 %v976_v0 }
  0x10   :  { %887 = vmatpush3.msra.mxu0 %v249_v14  ;;  %869 = vmatprep.subr.mxu1 %v976_v0  ;;  %v789_v14 = vld [vmem:[%s1272_s2 + $0x48] sm:$0xff] }
  0x11   :  { %888 = vmatprep.subr.mxu0 %v976_v0  ;;  %870 = vmatpush3.msra.mxu1 %v131_v20  ;;  %v776_v20 = vld [vmem:[%s1275_s6] ss:$0 sm:$0xff] }
  0x12   :  { %966 = vset.pattern.permute.xlu1 %v978_v4  ;;  %889 = vmatpush3.msra.mxu0 %v248_v15  ;;  %v788_v15 = vld [vmem:[%s1272_s2 + $0x40] sm:$0xff] }
  0x13   :  { %345 = vperm.xlu1 %966, %v783_v12   ;;  %967 = vset.pattern.permute.xlu0 %v979_v6 }
  0x14   :  { %443 = vperm.xlu0 %967, %v797_v17   ;;  %890 = vmatprep.subr.mxu0 %v976_v0 }
  0x15   :  { %891 = vmatpush3.msra.mxu0 %v247_v16  ;;  %871 = vmatprep.subr.mxu1 %v976_v0 }
  0x16   :  { %892 = vmatprep.subr.mxu0 %v976_v0  ;;  %872 = vmatpush3.msra.mxu1 %v130_v21 }
  0x17   :  { %968 = vset.pattern.permute.xlu1 %v981_v11  ;;  %893 = vmatpush3.msra.mxu0 %v246_v18  ;;  %v792_v11 = vld [vmem:[%s1272_s2 + $0x60] sm:$0xff] }
  0x18   :  { %450 = vperm.xlu1 %968, %v797_v17   ;;  %970 = vset.pattern.permute.xlu0 %v978_v4 }
  0x19   :  { %457 = vperm.xlu0 %970, %v797_v17   ;;  %916 = vmatprep.subr.mxu0 %v976_v0 }
  0x1a   :  { %873 = vmatprep.subr.mxu1 %v976_v0 }
  0x1b   :  { %874 = vmatpush3.msra.mxu1 %v129_v22 }
  0x1c   :  { %969 = vset.pattern.permute.xlu1 %v980_v9  ;;  %897 = vmatprep.subr.mxu1 %v976_v0 }
  0x1d   :  { %352 = vperm.xlu1 %969, %v783_v12   ;;  %971 = vset.pattern.permute.xlu0 %v980_v9  ;;  %v794_v9 = vld [vmem:[%s1272_s2 + $0x70] sm:$0xff]  ;;  %v791_v12 = vld [vmem:[%s1272_s2 + $0x58] sm:$0xff] }
  0x21   :  { %464 = vperm.xlu1 %969, %v797_v17  }
  0x7f   :  { %v234_v25 = vpop.permute.xlu1 %233 }
  0x80   :  { %v220_v26 = vpop.permute.xlu0 %219  ;;  %vm235_vm4 = vcmp.eq.s32.totalorder %v234_v25, %v1118_v24 }
  0x81   :  { %vm221_vm3 = vcmp.eq.s32.totalorder %v220_v26, %v1118_v24  ;;  %v780_v30 = vsel %vm235_vm4, 1.0, %v976_v0  ;;  %vm578_vm4 = vcmask 138240  }
  0x82   :  { %v778_v28 = vsel %vm221_vm3, 1.0, %v976_v0  ;;  %vm602_vm3 = vcmask 1045504  }
  0x84   :  { %v241_v27 = vpop.permute.xlu1 %240 }
  0x85   :  { %v227_v29 = vpop.permute.xlu0 %226  ;;  %vm242_vm5 = vcmp.eq.s32.totalorder %v241_v27, %v1118_v24 }
  0x86   :  { %vm228_vm6 = vcmp.eq.s32.totalorder %v227_v29, %v1118_v24  ;;  %v781_v34 = vsel %vm242_vm5, 1.0, %v976_v0  ;;  %vm580_vm5 = vcmask 146432  }
  0x87   :  { %v779_v31 = vsel %vm228_vm6, 1.0, %v976_v0  ;;  %vm582_vm6 = vcmask 154624  }
  0x88   :  { %v231_v32 = vadd.f32 %v779_v31, %v778_v28 }
  0x89   :  { %v332_v33 = vpop.permute.xlu1 %331 }
  0x8a   :  { %vm333_vm7 = vcmp.eq.s32.totalorder %v332_v33, %v1118_v24  ;;  %v339_v35 = vpop.permute.xlu0 %338  ;;  %v238_v36 = vadd.f32 %v780_v30, %v231_v32 }
  0x8b   :  { %v784_v37 = vsel %vm333_vm7, 1.0, %v976_v0  ;;  %vm340_vm8 = vcmp.eq.s32.totalorder %v339_v35, %v1118_v24  ;;  %vm584_vm7 = vcmask 162816  }
  0x8c   :  { %v785_v38 = vsel %vm340_vm8, 1.0, %v976_v0  ;;  %v245_v39 = vadd.f32 %v781_v34, %v238_v36  ;;  %vm586_vm8 = vcmask 171008  }
  0x8d   :  { %v343_v40 = vadd.f32 %v785_v38, %v784_v37 }
  0x8e   :  { %v346_v42 = vpop.permute.xlu1 %345  ;;  %895 = vmatmul.mubr.msk.f32.vlgmr.msra.gmra.mxu0 %vm254_vm9, %v245_v39  ;;  %v590_v39 = vld [vmem:[%s1276_s7 + $0x10] sm:$0x3f] }
  0x8f   :  { %vm347_vm10 = vcmp.eq.s32.totalorder %v346_v42, %v1118_v24  ;;  %v444_v44 = vpop.permute.xlu0 %443  ;;  %917 = vmatpush3.msra.mxu0 %v809_v41  ;;  %932 = vmatprep.mubr.msk.f32.mxu0 %vm977_vm1, %v976_v0  ;;  %v588_v41 = vld [vmem:[%s1276_s7] sm:$0xff] }
  0x90   :  { %v786_v45 = vsel %vm347_vm10, 1.0, %v976_v0  ;;  %918 = vmatprep.subr.mxu0 %v976_v0  ;;  %vm445_vm11 = vcmp.eq.s32.totalorder %v444_v44, %v1118_v24 }
  0x91   :  { %v350_v47 = vadd.f32 %v786_v45, %v343_v40  ;;  %919 = vmatpush3.msra.mxu0 %v808_v43  ;;  %v798_v50 = vsel %vm445_vm11, 1.0, %v976_v0  ;;  %v589_v40 = vld [vmem:[%s1276_s7 + $0x8] sm:$0xff] }
  0x92   :  { %920 = vmatprep.subr.mxu0 %v976_v0 }
  0x93   :  { %v451_v48 = vpop.permute.xlu1 %450  ;;  %921 = vmatpush3.msra.mxu0 %v807_v46 }
  0x94   :  { %vm452_vm12 = vcmp.eq.s32.totalorder %v451_v48, %v1118_v24  ;;  %v458_v51 = vpop.permute.xlu0 %457  ;;  %922 = vmatprep.subr.mxu0 %v976_v0 }
  0x95   :  { %v799_v52 = vsel %vm452_vm12, 1.0, %v976_v0  ;;  %vm459_vm13 = vcmp.eq.s32.totalorder %v458_v51, %v1118_v24  ;;  %923 = vmatpush3.msra.mxu0 %v806_v49 }
  0x96   :  { %v455_v54 = vadd.f32 %v799_v52, %v798_v50  ;;  %924 = vmatprep.subr.mxu0 %v976_v0  ;;  %v800_v57 = vsel %vm459_vm13, 1.0, %v976_v0 }
  0x97   :  { %925 = vmatpush3.msra.mxu0 %v805_v53  ;;  %v680_v53 = vld [vmem:[%s1277_s9 + $0x18] sm:$0xff] }
  0x98   :  { %v353_v56 = vpop.permute.xlu1 %352  ;;  %926 = vmatprep.subr.mxu0 %v976_v0  ;;  %v462_v61 = vadd.f32 %v800_v57, %v455_v54  ;;  %v677_v57 = vld [vmem:[%s1277_s9] sm:$0xff] }
  0x99   :  { %vm354_vm14 = vcmp.eq.s32.totalorder %v353_v56, %v1118_v24  ;;  %927 = vmatpush3.msra.mxu0 %v804_v55  ;;  %v679_v55 = vld [vmem:[%s1277_s9 + $0x10] sm:$0xff]  ;;  %v678_v56 = vld [vmem:[%s1277_s9 + $0x8] sm:$0xff] }
  0x9a   :  { %v787_v59 = vsel %vm354_vm14, 1.0, %v976_v0  ;;  %928 = vmatprep.subr.mxu0 %v976_v0 }
  0x9b   :  { %v357_v60 = vadd.f32 %v787_v59, %v350_v47  ;;  %929 = vmatpush3.msra.mxu0 %v803_v58  ;;  %v16_v58 = vstv %s1278_s10  ;;  %v811_v59 = vld [vmem:[%s1279_s8] ss:$0 sm:$0xff] }
  0x9c   :  { %v465_v63 = vpop.permute.xlu1 %464  ;;  %930 = vmatprep.subr.mxu0 %v976_v0  ;;  %17 = vst [vmem:[#allocation2] sm:$0x1] %v16_v58 }
  0x9d   :  { %vm466_vm15 = vcmp.eq.s32.totalorder %v465_v63, %v1118_v24  ;;  %931 = vmatpush3.msra.mxu0 %v802_v62 }
  0x9e   :  { %v801_v1 = vsel %vm466_vm15, 1.0, %v976_v0 }
  0x9f   :  { %v469_v2 = vadd.f32 %v801_v1, %v462_v61 }
  0xa1   :  { %933 = vmatmul.mubr.msk.f32.vlgmr.msra.gmra.mxu0 %vm254_vm9, %v469_v2 }
  0xc5   :  { %v124_v4 = vpop.f32.mrf.mxu0 }
  0xc6   :  { %v125_v5 = vadd.f32 %v773_v3, %v124_v4 }
  0xc7   :  { %v866_v6 = vpop.f32.mrf.mxu0 }
  0xc8   :  { %v128_v7 = vmax.f32 %v125_v5, 0.0 }
  0xca   :  { %876 = vmatmul.mubr.msk.f32.vlgmr.msra.gmra.mxu1 %vm140_vm0, %v128_v7 }
  0xcb   :  { %898 = vmatpush3.msra.mxu1 %v795_v8  ;;  %913 = vmatprep.mubr.msk.f32.mxu1 %vm977_vm1, %v976_v0 }
  0xcc   :  { %899 = vmatprep.subr.mxu1 %v976_v0 }
  0xcd   :  { %900 = vmatpush3.msra.mxu1 %v794_v9 }
  0xce   :  { %901 = vmatprep.subr.mxu1 %v976_v0 }
  0xcf   :  { %902 = vmatpush3.msra.mxu1 %v793_v10 }
  0xd0   :  { %903 = vmatprep.subr.mxu1 %v976_v0 }
  0xd1   :  { %904 = vmatpush3.msra.mxu1 %v792_v11 }
  0xd2   :  { %905 = vmatprep.subr.mxu1 %v976_v0 }
  0xd3   :  { %906 = vmatpush3.msra.mxu1 %v791_v12 }
  0xd4   :  { %907 = vmatprep.subr.mxu1 %v976_v0 }
  0xd5   :  { %908 = vmatpush3.msra.mxu1 %v790_v13 }
  0xd6   :  { %909 = vmatprep.subr.mxu1 %v976_v0 }
  0xd7   :  { %910 = vmatpush3.msra.mxu1 %v789_v14 }
  0xd8   :  { %911 = vmatprep.subr.mxu1 %v976_v0 }
  0xd9   :  { %912 = vmatpush3.msra.mxu1 %v788_v15 }
  0xda   :  { %914 = vmatmul.mubr.msk.f32.vlgmr.msra.gmra.mxu1 %vm254_vm9, %v357_v60  ;;  %935 = vmatprep.subr.mxu1 %v976_v0  ;;  %vm598_vm9 = vcmask 179200  }
  0xdb   :  { %941 = vmatprep.mubr.msk.f32.mxu1 %vm977_vm1, %v976_v0  ;;  %936 = vmatpush3.msk.msra.mxu1 %vm602_vm3, %v590_v39 }
  0xdc   :  { %937 = vmatprep.subr.mxu1 %v976_v0 }
  0xdd   :  { %938 = vmatpush3.msra.mxu1 %v589_v40 }
  0xde   :  { %939 = vmatprep.subr.mxu1 %v976_v0 }
  0xdf   :  { %940 = vmatpush3.msra.mxu1 %v588_v41 }
  0xe0   :  { %944 = vmatprep.subr.mxu1 %v976_v0 }
 0x14e   :  { %v324_v16 = vpop.f32.mrf.mxu0 }
 0x150   :  { %v896_v17 = vpop.f32.mrf.mxu0 }
 0x161   :  { %v548_v18 = vpop.f32.mrf.mxu0 }
 0x162   :  { %v569_v37 = vmul.f32 %v548_v18, %v324_v16 }
 0x163   :  { %v934_v19 = vpop.f32.mrf.mxu0 }
 0x164   :  { %v570_v38 = vsel %vm553_vm2, %v569_v37, 0.0 }
 0x18a   :  { %v210_v21 = vpop.f32.mrf.mxu1 }
 0x18b   :  { %v211_v22 = vadd.f32 %v776_v20, %v210_v21 }
 0x18c   :  { %v877_v23 = vpop.f32.mrf.mxu1 }
 0x18d   :  { %v214_v24 = vmax.f32 %v211_v22, 0.0 }
 0x18f   :  { %v552_v25 = vmul.f32 %v324_v16, %v214_v24  ;;  %v565_v27 = vmul.f32 %v548_v18, %v214_v24 }
 0x191   :  { %v554_v26 = vsel %vm553_vm2, %v552_v25, 0.0  ;;  %v566_v28 = vsel %vm553_vm2, %v565_v27, 0.0 }
 0x192   :  { %555 = vadd.xlane.f32.xlu1 %v554_v26 }
 0x196   :  { %567 = vadd.xlane.f32.xlu1 %v566_v28 }
 0x19a   :  { %v436_v29 = vpop.f32.mrf.mxu1 }
 0x19b   :  { %v557_v30 = vmul.f32 %v436_v29, %v214_v24  ;;  %v573_v31 = vmul.f32 %v548_v18, %v436_v29  ;;  %v561_v35 = vmul.f32 %v436_v29, %v324_v16 }
 0x19c   :  { %v915_v32 = vpop.f32.mrf.mxu1 }
 0x19d   :  { %v558_v33 = vsel %vm553_vm2, %v557_v30, 0.0  ;;  %v574_v34 = vsel %vm553_vm2, %v573_v31, 0.0  ;;  %v562_v36 = vsel %vm553_vm2, %v561_v35, 0.0 }
 0x19e   :  { %559 = vadd.xlane.f32.xlu0 %v558_v33  ;;  %575 = vadd.xlane.f32.xlu1 %v574_v34 }
 0x1a2   :  { %563 = vadd.xlane.f32.xlu0 %v562_v36 }
 0x1a6   :  { %571 = vadd.xlane.f32.xlu0 %v570_v38 }
 0x21b   :  { %v556_v42 = vpop.xlane.xlu1 %555 }
 0x21c   :  { %v577_v44 = vsel %vm553_vm2, %v214_v24, %v556_v42 }
 0x21f   :  { %v568_v47 = vpop.xlane.xlu1 %567 }
 0x227   :  { %v560_v43 = vpop.xlane.xlu0 %559  ;;  %v576_v51 = vpop.xlane.xlu1 %575 }
 0x228   :  { %v579_v45 = vsel %vm578_vm4, %v577_v44, %v560_v43 }
 0x22b   :  { %v564_v46 = vpop.xlane.xlu0 %563 }
 0x22c   :  { %v581_v48 = vsel %vm580_vm5, %v579_v45, %v564_v46 }
 0x22d   :  { %v583_v50 = vsel %vm582_vm6, %v581_v48, %v568_v47 }
 0x22f   :  { %v572_v49 = vpop.xlane.xlu0 %571 }
 0x230   :  { %v585_v52 = vsel %vm584_vm7, %v583_v50, %v572_v49 }
 0x231   :  { %v587_v54 = vsel %vm586_vm8, %v585_v52, %v576_v51 }
 0x232   :  { %942 = vmatmul.mubr.msk.f32.vlgmr.msra.gmra.mxu1 %vm598_vm9, %v587_v54 }
 0x233   :  { %945 = vmatpush3.msra.mxu1 %v680_v53  ;;  %952 = vmatprep.mubr.msk.f32.mxu1 %vm977_vm1, %v976_v0  ;;  %vm767_vm1 = vcmask 7168  }
 0x234   :  { %946 = vmatprep.subr.mxu1 %v976_v0 }
 0x235   :  { %947 = vmatpush3.msra.mxu1 %v679_v55 }
 0x236   :  { %948 = vmatprep.subr.mxu1 %v976_v0 }
 0x237   :  { %949 = vmatpush3.msra.mxu1 %v678_v56 }
 0x238   :  { %950 = vmatprep.subr.mxu1 %v976_v0  ;;  %v814_v0 = vld [vmem:[#allocation2] ss:$0 sm:$0xff] }
 0x239   :  { %951 = vmatpush3.msra.mxu1 %v677_v57 }
 0x2f2   :  { %v672_v60 = vpop.f32.mrf.mxu1 }
 0x2f3   :  { %v673_v61 = vadd.f32 %v811_v59, %v672_v60 }
 0x2f4   :  { %v943_v62 = vpop.f32.mrf.mxu1 }
 0x2f5   :  { %v676_v63 = vmax.f32 %v673_v61, 0.0 }
 0x2f7   :  { %953 = vmatmul.mubr.msk.f32.vlgmr.msra.gmra.mxu1 %vm140_vm0, %v676_v63 }
 0x3b7   :  { %v757_v1 = vpop.f32.mrf.mxu1 }
 0x3b8   :  { %v758_v2 = vadd.f32 %v814_v0, %v757_v1 }
 0x3b9   :  { %v954_v3 = vpop.f32.mrf.mxu1 }
 0x3ba   :  { %v761_v4 = vsub.f32 0.0, %v758_v2 }
 0x3bc   :  { %v762_v5 = vmul.f32 1.442695, %v761_v4 }
 0x3be   :  { %972 = vpow2.f32 %v762_v5 }
 0x3cb   :  { %v973_v6 = vpop.eup %972 }
 0x3cc   :  { %v764_v7 = vadd.f32 1.0, %v973_v6 }
 0x3ce   :  { %974 = vrcp.f32 %v764_v7 }
 0x3db   :  { %v975_v8 = vpop.eup %974 }
 0x3dc   :  { %768 = vst.msk [vmem:[%s1280_s11] sm:$0xff] %vm767_vm1, %v975_v8 }

</bundles_post_ra>
